<compile_context>
chip_gen: v5e
topology: v5e:2x2
jax: 0.10.0
libtpu: 0.0.40
codegen_flags: <defaults>
</compile_context>

<pallas_src>
import jax
import jax.numpy as jnp
from jax.experimental import pallas as pl
from jax.experimental.pallas import tpu as pltpu


def _copy_kernel(x_ref, o_ref):
    # Elementwise copy of the current VMEM tile (pure DMA/VPU passthrough).
    o_ref[...] = x_ref[...]


def _min_sublane(dtype) -> int:
    # f32 -> 8, bf16/f16 -> 16, int8/fp8 -> 32 (packed-vreg minimum rows).
    itemsize = jnp.dtype(dtype).itemsize
    return max(8, 32 // max(1, itemsize))


def _choose_lane_width(n, min_sub, max_lane):
    """Pick a lane width C (multiple of 128). Returns (C, needs_tail_pad)."""
    cand = min(max_lane, (n // 128) * 128)
    # Prefer an exact divisor of n that keeps at least `min_sub` rows
    # (full vregs, zero padding).
    c = cand
    while c >= 128:
        if n % c == 0 and (n // c) >= min_sub:
            return c, False
        c -= 128
    # Otherwise any exact divisor that is a multiple of 128.
    c = cand
    while c >= 128:
        if n % c == 0:
            return c, False
        c -= 128
    # Genuinely ragged size: keep lanes dense, pad only the (tiny) tail.
    c = max_lane if n >= min_sub * max_lane else 128
    return c, True


def identity(x, *, max_lane=2048, max_tile_bytes=4 * 1024 * 1024):
    """Pallas identity: returns an array equal to x (same shape, same dtype)."""
    orig_shape = x.shape
    dtype = x.dtype

    if x.size == 0:
        return x

    itemsize = jnp.dtype(dtype).itemsize
    min_sub = _min_sublane(dtype)

    flat = x.reshape(-1)  # metadata-only for contiguous row-major arrays
    n = flat.shape[0]

    lane, ragged = _choose_lane_width(n, min_sub, max_lane)
    rows = -(-n // lane)  # cdiv
    if ragged and rows * lane != n:
        # Minimal tail pad (< lane elements); only hit for ragged sizes.
        flat = jnp.pad(flat, (0, rows * lane - n))
    slab = flat.reshape(rows, lane)

    # Row-tile size: big enough to amortize per-step overhead, small enough
    # that 2x(in) + 2x(out) double buffers (4 x tile) stay well inside scoped
    # VMEM on every TPU generation (4 MiB tile -> 16 MiB total).
    cap_rows = max(
        min_sub, (max_tile_bytes // (lane * itemsize)) // min_sub * min_sub
    )
    if rows <= cap_rows:
        tile_rows = rows  # single row block; full-extent block dims are legal
    else:
        tile_rows = cap_rows
        t = cap_rows
        while t >= min_sub:  # prefer an exact divisor of `rows`
            if rows % t == 0:
                tile_rows = t
                break
            t -= min_sub
    grid = (pl.cdiv(rows, tile_rows),)

    out = pl.pallas_call(
        _copy_kernel,
        out_shape=jax.ShapeDtypeStruct((rows, lane), dtype),
        grid=grid,
        in_specs=[pl.BlockSpec((tile_rows, lane), lambda i: (i, 0))],
        out_specs=pl.BlockSpec((tile_rows, lane), lambda i: (i, 0)),
        compiler_params=pltpu.CompilerParams(
            dimension_semantics=("parallel",),
            vmem_limit_bytes=32 * 1024 * 1024,
        ),
    )(slab)

    out_flat = out.reshape(-1)
    if out_flat.shape[0] != n:
        out_flat = out_flat[:n]
    return out_flat.reshape(orig_shape)


if __name__ == "__main__":
    key = jax.random.PRNGKey(0)

    # Small NCHW-style input consistent with a generic forward(x) module.
    x = jax.random.normal(key, (2, 4, 16, 16), dtype=jnp.float32)
    y = identity(x)
    jax.block_until_ready(y)
    assert y.shape == x.shape, (y.shape, x.shape)
    assert y.dtype == x.dtype, (y.dtype, x.dtype)
    assert bool(jnp.array_equal(y, x)), "identity kernel output mismatch (f32)"

    # Ragged element count (exercises the minimal tail-pad fallback).
    xr = jax.random.normal(jax.random.PRNGKey(1), (3, 5, 7), dtype=jnp.float32)
    yr = identity(xr)
    jax.block_until_ready(yr)
    assert bool(jnp.array_equal(yr, xr)), "identity kernel output mismatch (ragged)"

    # Packed dtype (exercises the dtype-aware sublane minimum).
    xb = x.astype(jnp.bfloat16)
    yb = identity(xb)
    jax.block_until_ready(yb)
    assert yb.dtype == jnp.bfloat16
    assert bool(jnp.array_equal(yb, xb)), "identity kernel output mismatch (bf16)"

    print("KERNEL_OK")
</pallas_src>

<mosaic_0001>
module attributes {stable_mosaic.version = 11 : i64} {
  func.func @_copy_kernel(%arg0: i32, %arg1: memref<8x256xf32, #tpu.memory_space<vmem>>, %arg2: memref<8x256xf32, #tpu.memory_space<vmem>>) attributes {dimension_semantics = [#tpu.dimension_semantics<parallel>], iteration_bounds = array<i64: 1>, scalar_prefetch = 0 : i64, scratch_operands = 0 : i64, tpu.core_type = #tpu.core_type<tc>, window_params = [{transform_indices = @transform_0, window_bounds = array<i64: 8, 256>}, {transform_indices = @transform_1, window_bounds = array<i64: 8, 256>}]} {
    %c0 = arith.constant 0 : index
    %c0_0 = arith.constant 0 : index
    %0 = vector.load %arg1[%c0, %c0_0] : memref<8x256xf32, #tpu.memory_space<vmem>>, vector<8x256xf32>
    %c0_1 = arith.constant 0 : index
    %c0_2 = arith.constant 0 : index
    %1 = vector.load %arg2[%c0_1, %c0_2] : memref<8x256xf32, #tpu.memory_space<vmem>>, vector<8x256xf32>
    tpu.vector_store %arg2[%c0_1, %c0_2], %0 {strides = array<i32>} : memref<8x256xf32, #tpu.memory_space<vmem>>, vector<8x256xf32>,
    return
  }
  func.func @transform_0(%arg0: i32) -> (i32, i32) {
    %c0_i32 = arith.constant 0 : i32
    %c0_i32_0 = arith.constant 0 : i32
    return %arg0, %c0_i32 : i32, i32
  }
  func.func @transform_1(%arg0: i32) -> (i32, i32) {
    %c0_i32 = arith.constant 0 : i32
    %c0_i32_0 = arith.constant 0 : i32
    return %arg0, %c0_i32 : i32, i32
  }
}

</mosaic_0001>

<bundles_post_ra>
// kernel: tpu_custom_call.1
= control target key start
LH: loop header
LB: loop body
LE: loop exit
PB: predicated region body
PF: predicated region fallthrough
CT: control target
= control target key end

     0   :  { %6 = vsyncpa [#allocation3], 0  ;;  %s116_s0 = inlined_call_operand.hbm [shape: f32[8,256], index: 0, kind: input, shape index: {}]   ;;  %s117_s1 = inlined_call_operand.hbm [shape: f32[8,256], index: 1, kind: output, shape index: {}]  }
   0x1   :  { %7 = vsyncpa [#allocation4], 0  ;;  %s13_s8 = sshll.u32 %s116_s0, 4  ;;  %s98_s9 = smov [#allocation2]   ;;  %s14_s8 = int_to_ptr.hbm [resolvable:$true] %s13_s8 }
   0x2   :  { %s15_s10 = sshll.u32 %s98_s9, 4  ;;  %s16_s10 = int_to_ptr.vmem [resolvable:$true] %s15_s10 }
   0x3   :  { %18 = dma.hbm_to_vmem [thread:$0]  %s14_s8, 256, %s16_s10, [#allocation3]  }
   0x4   :  { %94 = dma.done.wait [#allocation3], 256  }
   0x5   :  { %95 = vsyncadd [#allocation3], 4294967040  ;;  %s99_s11 = smov [#allocation5]   ;;  %s34_s15 = sshll.u32 %s117_s1, 4  ;;  %v23_v0 = vld [vmem:[#allocation2] sm:$0xff]  ;;  %v24_v1 = vld [vmem:[#allocation2 + $0x8] sm:$0xff]  ;;  %s35_s15 = int_to_ptr.hbm [resolvable:$true] %s34_s15 }
   0x6   :  { %s32_s12 = sshll.u32 %s99_s11, 4  ;;  %25 = vst [vmem:[#allocation5] sm:$0xff] %v23_v0  ;;  %s33_s12 = int_to_ptr.vmem [resolvable:$true] %s32_s12 }
   0x7   :  { %26 = vst [vmem:[#allocation5 + $0x8] sm:$0xff] %v24_v1 }
   0x8   :  { %37 = dma.vmem_to_hbm [thread:$0]  %s33_s12, 256, %s35_s15, [#allocation4]  }
   0x9   :  { %96 = dma.done.wait [#allocation4], 256  }
   0xa   :  { %97 = vsyncadd [#allocation4], 4294967040 }
   0xb   :  { %42 = vsyncpa [#allocation3], 1 }
   0xc   :  { %43 = vsyncpa [#allocation4], 1 }

</bundles_post_ra>
